<compile_context>
chip_gen: v7x
topology: tpu7x:2x2x1
jax: 0.10.0
libtpu: 0.0.40
codegen_flags: <defaults>
</compile_context>

<pallas_src>
import functools

import jax
import jax.numpy as jnp
from jax.experimental import pallas as pl
from jax.experimental.pallas import tpu as pltpu


# ----------------------------- Pallas kernel ---------------------------------
def _conv_kernel(x_ref, w_ref, o_ref, xp_ref, *,
                 nb, h, w, cin, kh_taps, pad, k_pad):
    # x_ref:  VMEM (nb, H, W*Cin)       NHWC input, W/C merged on lanes (compute_dtype)
    # w_ref:  VMEM (k_pad, Wout*Cout)   block-Toeplitz weight, scale+bias folded in
    # o_ref:  VMEM (nb, Hout, Wout*Cout) lane-dense output (f32)
    # xp_ref: VMEM (nb, H+2*pad, W*Cin) H-padded scratch (compute_dtype, persistent)
    hout = h + 2 * pad - kh_taps + 1
    wcin = w * cin
    n_lanes = o_ref.shape[-1]                      # Wout * Cout
    cdt = w_ref.dtype                              # f32 or bf16 (MXU input dtype)

    # Halo rows never change: write the zeros only on the first grid step
    # (the scratch buffer persists across grid iterations).
    @pl.when(pl.program_id(0) == 0)
    def _():
        xp_ref[:, :pad, :] = jnp.zeros((nb, pad, wcin), cdt)
        xp_ref[:, pad + h:pad + h + pad, :] = jnp.zeros((nb, pad, wcin), cdt)

    # Scale is folded into the weight, so x goes into the scratch untouched.
    xp_ref[:, pad:pad + h, :] = x_ref[...]

    # im2row along H: concat the KH shifted slices on the lane axis, plus the
    # constant-1 lanes that pick up the bias row of the weight.  K = k_pad (256).
    parts = [xp_ref[:, kh:kh + hout, :] for kh in range(kh_taps)]
    n_extra = k_pad - kh_taps * wcin
    if n_extra > 0:
        parts.append(jnp.ones((nb, hout, n_extra), cdt))
    lhs = jnp.concatenate(parts, axis=-1).reshape(nb * hout, k_pad)

    # Single MXU matmul: (nb*Hout, 256) x (256, 128), f32 accumulation.
    acc = jnp.dot(lhs, w_ref[...], preferred_element_type=jnp.float32)
    o_ref[...] = acc.reshape(nb, hout, n_lanes).astype(o_ref.dtype)


# ------------------------------- wrapper --------------------------------------
def custom_conv_normal(x_nchw, weight_oihw, bias, affine_scale, *,
                       padding=1, block_n=None, compute_dtype=jnp.float32):
    """Pallas implementation of CustomConvNormal.forward.

    x_nchw:      (N, Cin, H, W) float32
    weight_oihw: (Cout, Cin, KH, KW) float32 -- already divided by affine_scale
    bias:        (Cout,) float32
    affine_scale: scalar
    block_n:     images per grid step (default: whole batch; use 1 on v7x to
                 split the batch across the two TensorCores).
    compute_dtype: MXU input dtype (jnp.bfloat16 on v6e/v7x for 2x matmul rate).
    Returns (N, Cout, Hout, Wout) float32 (stride 1, padding=padding).
    """
    n, cin, h, w = x_nchw.shape
    cout, cin_w, kh_dim, kw_dim = weight_oihw.shape
    assert cin_w == cin
    hout = h + 2 * padding - kh_dim + 1
    wout = w + 2 * padding - kw_dim + 1
    assert wout == w, "this kernel assumes 'same'-style padding along W"

    nb = n if block_n is None else block_n
    assert n % nb == 0

    # ---- layout plumbing (pure JAX, tiny; no padded HBM copy of x) ----------
    # NCHW -> (N, H, W*Cin): channels merged into the lane axis; single cast.
    x_flat = (jnp.transpose(x_nchw, (0, 2, 3, 1))
              .reshape(n, h, w * cin).astype(compute_dtype))

    # Fold the affine scale into the weight: conv(x*s, W') == conv(x, s*W').
    w_hwio = (jnp.transpose(weight_oihw, (2, 3, 1, 0)).astype(jnp.float32)
              * jnp.asarray(affine_scale, jnp.float32))       # (KH, KW, Cin, Cout)

    # Block-Toeplitz weight: fold the kw/ci taps (and the W zero-padding) into
    # one (W*Cin, Wout*Cout) matrix per kh, then stack the kh taps on K.
    #   big[kh*W*Cin + s*Cin+ci, w*Cout+co] = s * W'[kh, s-w+padding, ci, co]
    s_idx = jnp.arange(w)[:, None]                             # source column
    o_idx = jnp.arange(wout)[None, :]                          # output column
    tap = s_idx - o_idx + padding                              # (W, Wout) -> kw index
    valid = (tap >= 0) & (tap < kw_dim)
    tap_c = jnp.clip(tap, 0, kw_dim - 1)
    big = w_hwio[:, tap_c, :, :]                               # (KH, W, Wout, Cin, Cout)
    big = big * valid[None, :, :, None, None].astype(jnp.float32)
    big = jnp.transpose(big, (0, 1, 3, 2, 4)).reshape(kh_dim * w * cin, wout * cout)

    # Pad K to a multiple of 128 and fold the bias into the first padded row
    # (the kernel feeds constant-1 lanes for all padded K positions).
    k = kh_dim * w * cin                                       # 192
    k_pad = -(-(k + 1) // 128) * 128                           # 256
    b_row = jnp.tile(bias.astype(jnp.float32), wout).reshape(1, wout * cout)
    extra = jnp.concatenate(
        [b_row, jnp.zeros((k_pad - k - 1, wout * cout), jnp.float32)], axis=0)
    big = jnp.concatenate([big, extra], axis=0).astype(compute_dtype)  # (k_pad, Wout*Cout)

    kernel = functools.partial(_conv_kernel, nb=nb, h=h, w=w, cin=cin,
                               kh_taps=kh_dim, pad=padding, k_pad=k_pad)

    out_flat = pl.pallas_call(
        kernel,
        out_shape=jax.ShapeDtypeStruct((n, hout, wout * cout), jnp.float32),
        grid_spec=pltpu.PrefetchScalarGridSpec(
            num_scalar_prefetch=0,
            grid=(n // nb,),
            in_specs=[
                pl.BlockSpec((nb, h, w * cin), lambda i: (i, 0, 0)),        # x
                pl.BlockSpec((k_pad, wout * cout), lambda i: (0, 0)),       # weight+bias
            ],
            out_specs=pl.BlockSpec((nb, hout, wout * cout), lambda i: (i, 0, 0)),
            scratch_shapes=[pltpu.VMEM((nb, h + 2 * padding, w * cin), compute_dtype)],
        ),
        compiler_params=pltpu.CompilerParams(dimension_semantics=("parallel",)),
    )(x_flat, big)

    out = out_flat.reshape(n, hout, wout, cout)
    return jnp.transpose(out, (0, 3, 1, 2)).astype(x_nchw.dtype)   # back to NCHW


# ------------------------------- reference ------------------------------------
def _reference(x_nchw, weight_oihw, bias, affine_scale, *, padding=1):
    xs = x_nchw * affine_scale
    y = jax.lax.conv_general_dilated(
        xs, weight_oihw, window_strides=(1, 1),
        padding=((padding, padding), (padding, padding)),
        dimension_numbers=("NCHW", "OIHW", "NCHW"))
    return y + bias.reshape(1, -1, 1, 1)


# --------------------------------- main ----------------------------------------
if __name__ == "__main__":
    key = jax.random.PRNGKey(0)
    k_x, k_w, k_b = jax.random.split(key, 3)

    # Small shapes consistent with the module: Conv2d(4 -> 8, k=3, stride=1, pad=1)
    N, Cin, H, W = 2, 4, 16, 16
    Cout, KH, KW = 8, 3, 3

    x = jax.random.normal(k_x, (N, Cin, H, W), dtype=jnp.float32)
    w_raw = jax.random.normal(k_w, (Cout, Cin, KH, KW), dtype=jnp.float32)
    bias = jax.random.normal(k_b, (Cout,), dtype=jnp.float32)

    # __init__ semantics of CustomConvNormal:
    affine_scale = jnp.max(jnp.abs(w_raw))          # scalar channel_max
    w_scaled = w_raw * (1.0 / affine_scale)         # conv.weight after init rescale

    ref = _reference(x, w_scaled, bias, affine_scale)

    # f32 path, whole batch in one grid step (v5e / v6e default).
    out = jax.block_until_ready(custom_conv_normal(x, w_scaled, bias, affine_scale))
    assert out.shape == (N, Cout, H, W)
    assert jnp.allclose(out, ref, atol=1e-4, rtol=1e-4), "f32 mismatch vs reference conv"

    # f32 path, batch split across grid steps (v7x: one image per TensorCore);
    # also exercises the persistent-scratch halo guard.
    out_split = jax.block_until_ready(
        custom_conv_normal(x, w_scaled, bias, affine_scale, block_n=1))
    assert jnp.allclose(out_split, ref, atol=1e-4, rtol=1e-4), "block_n=1 mismatch"

    # bf16 MXU path (v6e/v7x): compare against a reference whose inputs /
    # folded weight / bias are identically bf16-rounded (f32 accumulation in both).
    out_bf16 = jax.block_until_ready(
        custom_conv_normal(x, w_scaled, bias, affine_scale,
                           compute_dtype=jnp.bfloat16))
    x_bf = x.astype(jnp.bfloat16).astype(jnp.float32)
    w_bf = (w_scaled * affine_scale).astype(jnp.bfloat16).astype(jnp.float32)
    b_bf = bias.astype(jnp.bfloat16).astype(jnp.float32)
    ref_bf = _reference(x_bf, w_bf, b_bf, jnp.float32(1.0))
    assert jnp.allclose(out_bf16, ref_bf, atol=1e-2, rtol=1e-2), "bf16 mismatch"

    print("KERNEL_OK")
</pallas_src>

<mosaic_0001>
module attributes {stable_mosaic.version = 11 : i64} {
  func.func @_conv_kernel(%arg0: i32, %arg1: memref<2x16x64xf32, #tpu.memory_space<vmem>>, %arg2: memref<256x128xf32, #tpu.memory_space<vmem>>, %arg3: memref<2x16x128xf32, #tpu.memory_space<vmem>>, %arg4: memref<2x18x64xf32, #tpu.memory_space<vmem>>) attributes {dimension_semantics = [#tpu.dimension_semantics<parallel>], iteration_bounds = array<i64: 1>, scalar_prefetch = 0 : i64, scratch_operands = 1 : i64, tpu.core_type = #tpu.core_type<tc>, window_params = [{transform_indices = @transform_0, window_bounds = array<i64: 2, 16, 64>}, {pipeline_mode = #tpu.pipeline_mode<synchronous>, transform_indices = @transform_1, window_bounds = array<i64: 256, 128>}, {transform_indices = @transform_2, window_bounds = array<i64: 2, 16, 128>}]} {
    %c0_i32 = arith.constant 0 : i32
    %0 = arith.cmpi eq, %arg0, %c0_i32 : i32
    %1 = arith.extui %0 : i1 to i32
    %c0_i32_0 = arith.constant 0 : i32
    %2 = arith.cmpi ne, %1, %c0_i32_0 : i32
    scf.if %2 {
      %cst_19 = arith.constant 0.000000e+00 : f32
      %15 = vector.broadcast %cst_19 : f32 to vector<2x1x64xf32>
      %c0_20 = arith.constant 0 : index
      %c0_21 = arith.constant 0 : index
      %c0_22 = arith.constant 0 : index
      %16 = vector.load %arg4[%c0_20, %c0_21, %c0_22] : memref<2x18x64xf32, #tpu.memory_space<vmem>>, vector<2x1x64xf32>
      tpu.vector_store %arg4[%c0_20, %c0_21, %c0_22], %15 {strides = array<i32>} : memref<2x18x64xf32, #tpu.memory_space<vmem>>, vector<2x1x64xf32>,
      %cst_23 = arith.constant 0.000000e+00 : f32
      %17 = vector.broadcast %cst_23 : f32 to vector<2x1x64xf32>
      %c0_24 = arith.constant 0 : index
      %c17 = arith.constant 17 : index
      %c0_25 = arith.constant 0 : index
      %18 = vector.load %arg4[%c0_24, %c17, %c0_25] : memref<2x18x64xf32, #tpu.memory_space<vmem>>, vector<2x1x64xf32>
      tpu.vector_store %arg4[%c0_24, %c17, %c0_25], %17 {strides = array<i32>} : memref<2x18x64xf32, #tpu.memory_space<vmem>>, vector<2x1x64xf32>,
    } else {
    }
    %c0 = arith.constant 0 : index
    %c0_1 = arith.constant 0 : index
    %c0_2 = arith.constant 0 : index
    %3 = vector.load %arg1[%c0, %c0_1, %c0_2] : memref<2x16x64xf32, #tpu.memory_space<vmem>>, vector<2x16x64xf32>
    %c0_3 = arith.constant 0 : index
    %c1 = arith.constant 1 : index
    %c0_4 = arith.constant 0 : index
    %4 = vector.load %arg4[%c0_3, %c1, %c0_4] : memref<2x18x64xf32, #tpu.memory_space<vmem>>, vector<2x16x64xf32>
    tpu.vector_store %arg4[%c0_3, %c1, %c0_4], %3 {strides = array<i32>} : memref<2x18x64xf32, #tpu.memory_space<vmem>>, vector<2x16x64xf32>,
    %c0_5 = arith.constant 0 : index
    %c0_6 = arith.constant 0 : index
    %c0_7 = arith.constant 0 : index
    %5 = vector.load %arg4[%c0_5, %c0_6, %c0_7] : memref<2x18x64xf32, #tpu.memory_space<vmem>>, vector<2x16x64xf32>
    %c0_8 = arith.constant 0 : index
    %c1_9 = arith.constant 1 : index
    %c0_10 = arith.constant 0 : index
    %6 = vector.load %arg4[%c0_8, %c1_9, %c0_10] : memref<2x18x64xf32, #tpu.memory_space<vmem>>, vector<2x16x64xf32>
    %c0_11 = arith.constant 0 : index
    %c2 = arith.constant 2 : index
    %c0_12 = arith.constant 0 : index
    %7 = vector.load %arg4[%c0_11, %c2, %c0_12] : memref<2x18x64xf32, #tpu.memory_space<vmem>>, vector<2x16x64xf32>
    %cst = arith.constant 1.000000e+00 : f32
    %8 = vector.broadcast %cst : f32 to vector<2x16x64xf32>
    %9 = tpu.concatenate %5, %6, %7, %8 in 2 : vector<2x16x64xf32>, vector<2x16x64xf32>, vector<2x16x64xf32>, vector<2x16x64xf32> -> vector<2x16x256xf32>
    %10 = vector.shape_cast %9 : vector<2x16x256xf32> to vector<32x256xf32>
    %c0_13 = arith.constant 0 : index
    %c0_14 = arith.constant 0 : index
    %11 = vector.load %arg2[%c0_13, %c0_14] : memref<256x128xf32, #tpu.memory_space<vmem>>, vector<256x128xf32>
    %cst_15 = arith.constant dense<0.000000e+00> : vector<32x128xf32>
    %12 = tpu.matmul %10, %11, %cst_15 {dimension_numbers = #tpu.dot_dimension_numbers<[1], [0], [0], [1], [0, 0, 1, 1], [], []>} : vector<32x256xf32>, vector<256x128xf32>, vector<32x128xf32> -> vector<32x128xf32>
    %13 = vector.shape_cast %12 : vector<32x128xf32> to vector<2x16x128xf32>
    %c0_16 = arith.constant 0 : index
    %c0_17 = arith.constant 0 : index
    %c0_18 = arith.constant 0 : index
    %14 = vector.load %arg3[%c0_16, %c0_17, %c0_18] : memref<2x16x128xf32, #tpu.memory_space<vmem>>, vector<2x16x128xf32>
    tpu.vector_store %arg3[%c0_16, %c0_17, %c0_18], %13 {strides = array<i32>} : memref<2x16x128xf32, #tpu.memory_space<vmem>>, vector<2x16x128xf32>,
    return
  }
  func.func @transform_0(%arg0: i32) -> (i32, i32, i32) {
    %c0_i32 = arith.constant 0 : i32
    %c0_i32_0 = arith.constant 0 : i32
    %c0_i32_1 = arith.constant 0 : i32
    return %arg0, %c0_i32, %c0_i32_0 : i32, i32, i32
  }
  func.func @transform_1(%arg0: i32) -> (i32, i32) {
    %c0_i32 = arith.constant 0 : i32
    %c0_i32_0 = arith.constant 0 : i32
    %c0_i32_1 = arith.constant 0 : i32
    return %c0_i32, %c0_i32_0 : i32, i32
  }
  func.func @transform_2(%arg0: i32) -> (i32, i32, i32) {
    %c0_i32 = arith.constant 0 : i32
    %c0_i32_0 = arith.constant 0 : i32
    %c0_i32_1 = arith.constant 0 : i32
    return %arg0, %c0_i32, %c0_i32_0 : i32, i32, i32
  }
}

</mosaic_0001>

<bundles_post_ra>
// kernel: tpu_custom_call.1
= control target key start
LH: loop header
LB: loop body
LE: loop exit
PB: predicated region body
PF: predicated region fallthrough
CT: control target
= control target key end

     0   :  { %7 = vsyncpa [#allocation4], 0  ;;  %s493_s0 = inlined_call_operand.hbm [shape: f32[2,16,64], index: 0, kind: input, shape index: {}]   ;;  %s494_s1 = inlined_call_operand.hbm [shape: f32[256,128], index: 1, kind: input, shape index: {}]   ;;  %s495_s2 = inlined_call_operand.hbm [shape: f32[2,16,128], index: 2, kind: output, shape index: {}]  }
   0x1   :  { %8 = vsyncpa [#allocation7], 0 }
   0x2   :  { %9 = vsyncpa [#allocation5], 0  ;;  %s414_s9 = smov [#allocation3]   ;;  %s342_s13 = scalar_lea.hbm %s493_s0, 512 }
   0x3   :  { %s15_s10 = sshll.u32 %s414_s9, 4  ;;  %p343_p0 = scmp.ne.s32.totalorder %s493_s0, %s342_s13  ;;  %s16_s10 = int_to_ptr.vmem [resolvable:$true] %s15_s10 }
   0x4   :  { %p346_p1 = scmp.lt.u32.totalorder %s342_s13, %s493_s0 }
   0x6   :  { %p348_p2 = pnand %p346_p1, %p343_p0 }
   0x8   :  { %351 = shalt.err (!%p348_p2)
}
   0x9   :  { %s352_s18 = scalar_lea.vmem %s16_s10, 512  ;;  %p357_p4 = scmp.lt.s32.totalorder %s16_s10, %s16_s10 }
   0xa   :  { %p353_p3 = scmp.ne.s32.totalorder %s16_s10, %s352_s18  ;;  %p358_p5 = scmp.lt.s32.totalorder %s352_s18, %s352_s18 }
   0xc   :  { %p359_p6 = por %p358_p5, %p357_p4 }
   0xe   :  { %p360_p7 = pnand %p359_p6, %p353_p3 }
  0x10   :  { %363 = shalt.err (!%p360_p7)
}
  0x11   :  { %s415_s19 = smov 128   ;;  %s416_s20 = smov 8  }
  0x12   :  { %21 = dma.hbm_to_vmem [thread:$0]  %s493_s0, 512, %s16_s10, [#allocation4], %s415_s19, %s415_s19, %s416_s20  }
  0x13   :  { %s417_s23 = smov [#allocation6]   ;;  %s364_s27 = scalar_lea.hbm %s494_s1, 4096 }
  0x14   :  { %s27_s24 = sshll.u32 %s417_s23, 4  ;;  %p365_p8 = scmp.ne.s32.totalorder %s494_s1, %s364_s27  ;;  %s28_s24 = int_to_ptr.vmem [resolvable:$true] %s27_s24 }
  0x15   :  { %p368_p9 = scmp.lt.u32.totalorder %s364_s27, %s494_s1 }
  0x17   :  { %p370_p10 = pnand %p368_p9, %p365_p8 }
  0x19   :  { %373 = shalt.err (!%p370_p10)
}
  0x1a   :  { %s374_s4 = scalar_lea.vmem %s28_s24, 4096  ;;  %p379_p12 = scmp.lt.s32.totalorder %s28_s24, %s28_s24 }
  0x1b   :  { %p375_p11 = scmp.ne.s32.totalorder %s28_s24, %s374_s4  ;;  %p380_p13 = scmp.lt.s32.totalorder %s374_s4, %s374_s4 }
  0x1d   :  { %p381_p0 = por %p380_p13, %p379_p12 }
  0x1f   :  { %p382_p1 = pnand %p381_p0, %p375_p11 }
  0x21   :  { %385 = shalt.err (!%p382_p1)
}
  0x22   :  { %33 = dma.hbm_to_vmem [thread:$0]  %s494_s1, 4096, %s28_s24, [#allocation7], %s415_s19, %s415_s19, %s416_s20  }
  0x23   :  { %408 = dma.done.wait [#allocation4], 512  }
  0x24   :  { %409 = vsyncadd [#allocation4], 4294966784 }
  0x25   :  { %410 = dma.done.wait [#allocation7], 4096  }
  0x26   :  { %411 = vsyncadd [#allocation7], 4294963200  ;;  %vm44_vm0 = vcmask 516096   ;;  %v418_v0 = vmov 0.0   ;;  %vm53_vm1 = vcmask 523264   ;;  %v49_v1 = vld [vmem:[#allocation3] sm:$0xff] }
  0x27   :  { %45 = vst.msk [vmem:[#allocation2] sm:$0x1] %vm44_vm0, %v418_v0  ;;  %46 = vst.msk [vmem:[#allocation2 + $0x18] sm:$0x1] %vm44_vm0, %v418_v0  ;;  %v51_v2 = vld [vmem:[#allocation3 + $0x10] sm:$0xff]  ;;  %v50_v3 = vld [vmem:[#allocation3 + $0x8] sm:$0xff] }
  0x28   :  { %47 = vst.msk [vmem:[#allocation2 + $0x11] sm:$0x1] %vm44_vm0, %v418_v0  ;;  %48 = vst.msk [vmem:[#allocation2 + $0x29] sm:$0x1] %vm44_vm0, %v418_v0  ;;  %v52_v4 = vld [vmem:[#allocation3 + $0x18] sm:$0xff]  ;;  %v110_v5 = vld [vmem:[#allocation6 + $0x80] sm:$0xff] }
  0x29   :  { %54 = vst.msk [vmem:[#allocation2 + $0x1] sm:$0xff] %vm53_vm1, %v49_v1  ;;  %56 = vst.msk [vmem:[#allocation2 + $0x19] sm:$0xff] %vm53_vm1, %v51_v2  ;;  %v111_v6 = vld [vmem:[#allocation6 + $0x88] sm:$0xff]  ;;  %v94_v8 = vld [vmem:[#allocation6] sm:$0xff]  ;;  %s419_s1 = smov 64   ;;  %s420_s6 = smov [#allocation8]  }
  0x2a   :  { %55 = vst.msk [vmem:[#allocation2 + $0x9] sm:$0xff] %vm53_vm1, %v50_v3  ;;  %57 = vst.msk [vmem:[#allocation2 + $0x21] sm:$0xff] %vm53_vm1, %v52_v4  ;;  %v277_v7 = vpack.c.bf16 %v111_v6, %v110_v5  ;;  %v95_v9 = vld [vmem:[#allocation6 + $0x8] sm:$0xff]  ;;  %v112_v10 = vld [vmem:[#allocation6 + $0x90] sm:$0xff]  ;;  %s220_s7 = sshll.u32 %s420_s6, 4  ;;  %s221_s7 = int_to_ptr.vmem [resolvable:$true] %s220_s7 }
  0x2b   :  { %v279_v11 = vpack.c.bf16 %v95_v9, %v94_v8  ;;  %v113_v12 = vld [vmem:[#allocation6 + $0x98] sm:$0xff]  ;;  %v96_v13 = vld [vmem:[#allocation6 + $0x10] sm:$0xff]  ;;  %v114_v16 = vld [vmem:[#allocation6 + $0xa0] sm:$0xff]  ;;  %s386_s8 = scalar_lea.vmem %s221_s7, 512  ;;  %p391_p3 = scmp.lt.s32.totalorder %s221_s7, %s221_s7 }
  0x2c   :  { %v97_v14 = vld [vmem:[#allocation6 + $0x18] sm:$0xff]  ;;  %278 = vmatprep.subr.bf16.mxu0 %v277_v7  ;;  %309 = vmatprep.subr.bf16.mxu1 %v277_v7  ;;  %v281_v15 = vpack.c.bf16 %v113_v12, %v112_v10  ;;  %v115_v17 = vld [vmem:[#allocation6 + $0xa8] sm:$0xff]  ;;  %v98_v20 = vld [vmem:[#allocation6 + $0x20] sm:$0xff]  ;;  %p387_p2 = scmp.ne.s32.totalorder %s221_s7, %s386_s8  ;;  %p392_p4 = scmp.lt.s32.totalorder %s386_s8, %s386_s8 }
  0x2d   :  { %280 = vmatpush3.bf16.msra.mxu0 %v279_v11  ;;  %317 = vmatpush3.bf16.msra.mxu1 %v279_v11  ;;  %v283_v18 = vpack.c.bf16 %v97_v14, %v96_v13  ;;  %v285_v19 = vpack.c.bf16 %v115_v17, %v114_v16  ;;  %v99_v21 = vld [vmem:[#allocation6 + $0x28] sm:$0xff]  ;;  %v116_v22 = vld [vmem:[#allocation6 + $0xb0] sm:$0xff]  ;;  %v117_v23 = vld [vmem:[#allocation6 + $0xb8] sm:$0xff] }
  0x2e   :  { %282 = vmatprep.subr.bf16.mxu0 %v281_v15  ;;  %310 = vmatprep.subr.bf16.mxu1 %v281_v15  ;;  %v287_v29 = vpack.c.bf16 %v99_v21, %v98_v20  ;;  %v289_v30 = vpack.c.bf16 %v117_v23, %v116_v22  ;;  %v100_v31 = vld [vmem:[#allocation6 + $0x30] sm:$0xff]  ;;  %v101_v32 = vld [vmem:[#allocation6 + $0x38] sm:$0xff]  ;;  %v118_v34 = vld [vmem:[#allocation6 + $0xc0] sm:$0xff]  ;;  %p393_p5 = por %p392_p4, %p391_p3 }
  0x2f   :  { %v119_v35 = vld [vmem:[#allocation6 + $0xc8] sm:$0xff]  ;;  %v291_v36 = vpack.c.bf16 %v101_v32, %v100_v31  ;;  %v102_v40 = vld [vmem:[#allocation6 + $0x40] sm:$0xff]  ;;  %v120_v44 = vld [vmem:[#allocation6 + $0xd0] sm:$0xff] }
  0x30   :  { %v62_v24 = vld [vmem:[#allocation2 + $0x1] sm:$0xff]  ;;  %v64_v25 = vld [vmem:[#allocation2 + $0x19] sm:$0xff]  ;;  %v293_v39 = vpack.c.bf16 %v119_v35, %v118_v34  ;;  %v122_v50 = vld [vmem:[#allocation6 + $0xe0] sm:$0xff]  ;;  %p394_p6 = pnand %p393_p5, %p387_p2 }
  0x31   :  { %v63_v26 = vld [vmem:[#allocation2 + $0x9] sm:$0xff]  ;;  %v332_v27 = vpack.i.bf16 %v64_v25, %v62_v24  ;;  %v65_v28 = vld [vmem:[#allocation2 + $0x21] sm:$0xff]  ;;  %284 = vmatpush3.bf16.msra.mxu0 %v283_v18  ;;  %318 = vmatpush3.bf16.msra.mxu1 %v283_v18  ;;  %v103_v41 = vld [vmem:[#allocation6 + $0x48] sm:$0xff] }
  0x32   :  { %286 = vmatprep.subr.bf16.mxu0 %v285_v19  ;;  %311 = vmatprep.subr.bf16.mxu1 %v285_v19  ;;  %v337_v33 = vpack.i.bf16 %v65_v28, %v63_v26  ;;  %v66_v37 = vld [vmem:[#allocation2 + $0x2] sm:$0xff]  ;;  %v68_v38 = vld [vmem:[#allocation2 + $0x1a] sm:$0xff]  ;;  %v295_v46 = vpack.c.bf16 %v103_v41, %v102_v40  ;;  %v106_v54 = vld [vmem:[#allocation6 + $0x60] sm:$0xff] }
  0x33   :  { %333 = vrot.lane.b32.xlu0 %v332_v27, %s419_s1  ;;  %v90_v42 = vsel %vm53_vm1, %v66_v37, 1.0  ;;  %v92_v43 = vsel %vm53_vm1, %v68_v38, 1.0  ;;  %v121_v45 = vld [vmem:[#allocation6 + $0xd8] sm:$0xff]  ;;  %v104_v48 = vld [vmem:[#allocation6 + $0x50] sm:$0xff]  ;;  %v123_v51 = vld [vmem:[#allocation6 + $0xe8] sm:$0xff] }
  0x34   :  { %190 = vmatprep.mubr.f32.mxu0 %v90_v42  ;;  %200 = vmatprep.mubr.f32.mxu1 %v92_v43  ;;  %v297_v47 = vpack.c.bf16 %v121_v45, %v120_v44  ;;  %v105_v49 = vld [vmem:[#allocation6 + $0x58] sm:$0xff]  ;;  %v301_v53 = vpack.c.bf16 %v123_v51, %v122_v50  ;;  %v107_v55 = vld [vmem:[#allocation6 + $0x68] sm:$0xff]  ;;  %v124_v56 = vld [vmem:[#allocation6 + $0xf0] sm:$0xff] }
  0x35   :  { %288 = vmatpush3.bf16.msra.mxu0 %v287_v29  ;;  %319 = vmatpush3.bf16.msra.mxu1 %v287_v29  ;;  %v299_v52 = vpack.c.bf16 %v105_v49, %v104_v48  ;;  %v125_v57 = vld [vmem:[#allocation6 + $0xf8] sm:$0xff]  ;;  %v303_v58 = vpack.c.bf16 %v107_v55, %v106_v54  ;;  %v108_v60 = vld [vmem:[#allocation6 + $0x70] sm:$0xff]  ;;  %v60_v3 = vld [vmem:[#allocation2 + $0x18] sm:$0xff] }
  0x36   :  { %290 = vmatprep.subr.bf16.mxu0 %v289_v30  ;;  %312 = vmatprep.subr.bf16.mxu1 %v289_v30  ;;  %v305_v59 = vpack.c.bf16 %v125_v57, %v124_v56  ;;  %v109_v61 = vld [vmem:[#allocation6 + $0x78] sm:$0xff]  ;;  %v58_v2 = vld [vmem:[#allocation2] sm:$0xff] }
  0x37   :  { %338 = vrot.lane.b32.xlu0 %v337_v33, %s419_s1  ;;  %v307_v62 = vpack.c.bf16 %v109_v61, %v108_v60  ;;  %v67_v63 = vld [vmem:[#allocation2 + $0xa] sm:$0xff]  ;;  %v69_v0 = vld [vmem:[#allocation2 + $0x22] sm:$0xff] }
  0x38   :  { %v91_v6 = vsel %vm53_vm1, %v67_v63, 1.0  ;;  %v93_v7 = vsel %vm53_vm1, %v69_v0, 1.0  ;;  %v59_v11 = vld [vmem:[#allocation2 + $0x8] sm:$0xff]  ;;  %v61_v12 = vld [vmem:[#allocation2 + $0x20] sm:$0xff] }
  0x39   :  { %292 = vmatpush3.bf16.msra.mxu0 %v291_v36  ;;  %320 = vmatpush3.bf16.msra.mxu1 %v291_v36 }
  0x3a   :  { %294 = vmatprep.subr.bf16.mxu0 %v293_v39  ;;  %313 = vmatprep.subr.bf16.mxu1 %v293_v39 }
  0x3d   :  { %296 = vmatpush3.bf16.msra.mxu0 %v295_v46  ;;  %321 = vmatpush3.bf16.msra.mxu1 %v295_v46 }
  0x3e   :  { %298 = vmatprep.subr.bf16.mxu0 %v297_v47  ;;  %314 = vmatprep.subr.bf16.mxu1 %v297_v47 }
  0x41   :  { %300 = vmatpush3.bf16.msra.mxu0 %v299_v52  ;;  %322 = vmatpush3.bf16.msra.mxu1 %v299_v52 }
  0x42   :  { %302 = vmatprep.subr.bf16.mxu0 %v301_v53  ;;  %315 = vmatprep.subr.bf16.mxu1 %v301_v53 }
  0x45   :  { %304 = vmatpush3.bf16.msra.mxu0 %v303_v58  ;;  %323 = vmatpush3.bf16.msra.mxu1 %v303_v58 }
  0x46   :  { %306 = vmatprep.subr.bf16.mxu0 %v305_v59  ;;  %316 = vmatprep.subr.bf16.mxu1 %v305_v59 }
  0x49   :  { %308 = vmatpush3.bf16.msra.mxu0 %v307_v62  ;;  %324 = vmatpush3.bf16.msra.mxu1 %v307_v62 }
  0xa5   :  { %v334_v1 = vpop.permute.xlu0 %333 }
  0xa6   :  { %v336_v4 = vunpack.i.h.bf16 %v334_v1  ;;  %v335_v5 = vunpack.i.l.bf16 %v334_v1 }
  0xa8   :  { %v86_v8 = vsel %vm53_vm1, %v58_v2, %v335_v5  ;;  %v88_v9 = vsel %vm53_vm1, %v60_v3, %v336_v4 }
  0xa9   :  { %v339_v10 = vpop.permute.xlu0 %338  ;;  %191 = vmatmul.mubr.f32.vlgmr.msra.gmra.mrb[0].mxu0 %v86_v8  ;;  %201 = vmatmul.mubr.f32.vlgmr.msra.gmra.mrb[0].mxu1 %v88_v9 }
  0xaa   :  { %v341_v13 = vunpack.i.h.bf16 %v339_v10  ;;  %v340_v14 = vunpack.i.l.bf16 %v339_v10  ;;  %195 = vmatprep.mubr.f32.mxu0 %v91_v6  ;;  %205 = vmatprep.mubr.f32.mxu1 %v93_v7 }
  0xac   :  { %v87_v15 = vsel %vm53_vm1, %v59_v11, %v340_v14  ;;  %v89_v16 = vsel %vm53_vm1, %v61_v12, %v341_v13 }
  0xad   :  { %196 = vmatmul.mubr.f32.gmra.mrb[2].mxu0 %v87_v15  ;;  %206 = vmatmul.mubr.f32.gmra.mrb[2].mxu1 %v89_v16 }
 0x17c   :  { %v265_v17 = vpop.f32.mrb[0].mxu0  ;;  %v271_v18 = vpop.f32.mrb[0].mxu1 }
 0x17d   :  { %v266_v19 = vpop.f32.mrb[1].mxu0  ;;  %v272_v20 = vpop.f32.mrb[1].mxu1 }
 0x17e   :  { %v267_v21 = vadd.f32 %v266_v19, %v265_v17  ;;  %v273_v22 = vadd.f32 %v272_v20, %v271_v18 }
 0x180   :  { %211 = vst [vmem:[#allocation8] sm:$0xff] %v267_v21  ;;  %213 = vst [vmem:[#allocation8 + $0x10] sm:$0xff] %v273_v22  ;;  %v268_v23 = vpop.f32.mrb[2].mxu0  ;;  %v274_v24 = vpop.f32.mrb[2].mxu1 }
 0x181   :  { %v269_v25 = vpop.f32.mrb[3].mxu0  ;;  %v275_v26 = vpop.f32.mrb[3].mxu1 }
 0x182   :  { %v270_v27 = vadd.f32 %v269_v25, %v268_v23  ;;  %v276_v28 = vadd.f32 %v275_v26, %v274_v24 }
 0x184   :  { %212 = vst [vmem:[#allocation8 + $0x8] sm:$0xff] %v270_v27  ;;  %214 = vst [vmem:[#allocation8 + $0x18] sm:$0xff] %v276_v28 }
 0x185   :  { %397 = shalt.err (!%p394_p6)
}
 0x186   :  { %s398_s11 = scalar_lea.hbm %s495_s2, 512 }
 0x187   :  { %p399_p7 = scmp.ne.s32.totalorder %s495_s2, %s398_s11  ;;  %p402_p8 = scmp.lt.u32.totalorder %s398_s11, %s495_s2 }
 0x189   :  { %p404_p9 = pnand %p402_p8, %p399_p7 }
 0x18b   :  { %407 = shalt.err (!%p404_p9)
}
 0x18c   :  { %226 = dma.vmem_to_hbm [thread:$0]  %s221_s7, 512, %s495_s2, [#allocation5], %s415_s19, %s415_s19, %s416_s20  }
 0x18d   :  { %412 = dma.done.wait [#allocation5], 512  }
 0x18e   :  { %413 = vsyncadd [#allocation5], 4294966784 }
 0x18f   :  { %230 = vsyncpa [#allocation4], 1 }
 0x190   :  { %231 = vsyncpa [#allocation7], 1 }
 0x191   :  { %232 = vsyncpa [#allocation5], 1 }

</bundles_post_ra>
